<compile_context>
chip_gen: v7x
topology: tpu7x:2x2x1
jax: 0.10.0
libtpu: 0.0.40
codegen_flags: <defaults>
</compile_context>

<pallas_src>
import jax
import jax.numpy as jnp
from jax.experimental import pallas as pl
from jax.experimental.pallas import tpu as pltpu

NEG_SLOPE = 0.01      # nn.LeakyReLU() default negative_slope


def _controller_kernel(x_ref, w1_ref, b1_ref, w2_ref, b2_ref, w3_ref, b3_ref,
                       out_ref):
    x = x_ref[...]                                                      # (TB, D)

    # fc1 + LeakyReLU  (max(h, a*h) == leaky_relu(h) for 0 < a < 1)
    h1 = jnp.dot(x, w1_ref[...], preferred_element_type=jnp.float32) + b1_ref[...]
    h1 = jnp.maximum(h1, NEG_SLOPE * h1)                                # (TB, 32)

    # fc2 + LeakyReLU
    h2 = jnp.dot(h1, w2_ref[...], preferred_element_type=jnp.float32) + b2_ref[...]
    h2 = jnp.maximum(h2, NEG_SLOPE * h2)                                # (TB, 16)

    # fc3: out_features == 1 -> elementwise mul + lane reduce (w3 kept in its
    # PyTorch (1, 16) row layout), avoids an N=1 MXU matmul.
    logits = jnp.sum(h2 * w3_ref[...], axis=-1, keepdims=True) + b3_ref[...]  # (TB, 1)

    # sigmoid; exact reciprocal (not approx) so it matches the f32 reference
    # tightly.  exp goes to the EUP, which has its own bundle slot.
    out_ref[...] = pl.reciprocal(1.0 + jnp.exp(-logits))                # (TB, 1)


def controller_forward(x, params, *, tb=512):
    """x: (B, input_dim) f32.  Returns sigmoid output of shape (B, 1)."""
    w1, b1, w2, b2, w3, b3 = params
    B, D = x.shape

    # Shrink the batch tile for small batches (single grid step, minimal pad),
    # keep it a multiple of 8 for the (8, 128) sublane constraint.
    tb = max(8, min(tb, ((B + 7) // 8) * 8))
    assert tb % 8 == 0, "batch tile must respect the (8, 128) sublane constraint"

    n_tiles = pl.cdiv(B, tb)
    b_pad = n_tiles * tb
    if b_pad != B:
        x = jnp.pad(x, ((0, b_pad - B), (0, 0)))

    resident = lambda i: (0, 0)   # weights/biases stay VMEM-resident across the grid

    out_padded = pl.pallas_call(
        _controller_kernel,
        out_shape=jax.ShapeDtypeStruct((b_pad, 1), jnp.float32),
        grid=(n_tiles,),
        in_specs=[
            pl.BlockSpec((tb, D), lambda i: (i, 0)),      # x tiled over batch
            pl.BlockSpec(w1.shape, resident),
            pl.BlockSpec(b1.shape, resident),
            pl.BlockSpec(w2.shape, resident),
            pl.BlockSpec(b2.shape, resident),
            pl.BlockSpec(w3.shape, resident),
            pl.BlockSpec(b3.shape, resident),
        ],
        out_specs=pl.BlockSpec((tb, 1), lambda i: (i, 0)),
        compiler_params=pltpu.CompilerParams(
            dimension_semantics=("parallel",)),           # v7x: 2 TCs share batch tiles
    )(x, w1, b1, w2, b2, w3, b3)

    # Drop batch padding in the wrapper (layout plumbing only).
    return out_padded[:B]


def init_params(key, input_dim):
    """Deterministic synthetic init matching nn.Linear shapes.

    PyTorch stores weights as (out, in); fc1/fc2 are pre-transposed to
    (in, out) so the kernel computes x @ W + b on the MXU.  fc3's weight is
    kept in its PyTorch (1, 16) layout because the kernel evaluates it as a
    mul + lane-reduce.  Biases are reshaped to (1, out).
    """
    ks = jax.random.split(key, 6)

    def linear_t(kw, kb, fan_in, fan_out):
        bound = 1.0 / float(jnp.sqrt(jnp.float32(fan_in)))
        w = jax.random.uniform(kw, (fan_in, fan_out), jnp.float32, -bound, bound)
        b = jax.random.uniform(kb, (1, fan_out), jnp.float32, -bound, bound)
        return w, b

    w1, b1 = linear_t(ks[0], ks[1], input_dim, 32)
    w2, b2 = linear_t(ks[2], ks[3], 32, 16)
    bound3 = 1.0 / float(jnp.sqrt(jnp.float32(16)))
    w3 = jax.random.uniform(ks[4], (1, 16), jnp.float32, -bound3, bound3)   # PyTorch layout
    b3 = jax.random.uniform(ks[5], (1, 1), jnp.float32, -bound3, bound3)
    return (w1, b1, w2, b2, w3, b3)


def _reference(x, params):
    hi = jax.lax.Precision.HIGHEST
    w1, b1, w2, b2, w3, b3 = params
    h1 = jnp.dot(x, w1, precision=hi) + b1
    h1 = jnp.where(h1 > 0, h1, NEG_SLOPE * h1)
    h2 = jnp.dot(h1, w2, precision=hi) + b2
    h2 = jnp.where(h2 > 0, h2, NEG_SLOPE * h2)
    logits = jnp.dot(h2, w3.T, precision=hi) + b3
    return jax.nn.sigmoid(logits)


if __name__ == "__main__":
    key = jax.random.PRNGKey(0)
    k_param, k_x = jax.random.split(key)

    batch, input_dim = 20, 16           # small toy shapes
    params = init_params(k_param, input_dim)
    x = jax.random.normal(k_x, (batch, input_dim), jnp.float32)

    # tb=8 exercises a multi-step batch grid (3 tiles, incl. batch padding) at
    # toy size; production would use the default tb=512.
    out = controller_forward(x, params, tb=8)
    jax.block_until_ready(out)

    ref = _reference(x, params)
    assert out.shape == (batch, 1)
    assert jnp.allclose(out, ref, atol=1e-4, rtol=1e-4)
    assert bool(jnp.all((out >= 0.0) & (out <= 1.0)))

    # Also exercise the single-tile (clamped default tb) path.
    out2 = controller_forward(x, params)
    jax.block_until_ready(out2)
    assert jnp.allclose(out2, ref, atol=1e-4, rtol=1e-4)

    print("KERNEL_OK")
</pallas_src>

<mosaic_0001>
module attributes {stable_mosaic.version = 11 : i64} {
  func.func @_controller_kernel(%arg0: i32, %arg1: memref<8x16xf32, #tpu.memory_space<vmem>>, %arg2: memref<16x32xf32, #tpu.memory_space<vmem>>, %arg3: memref<1x32xf32, #tpu.memory_space<vmem>>, %arg4: memref<32x16xf32, #tpu.memory_space<vmem>>, %arg5: memref<1x16xf32, #tpu.memory_space<vmem>>, %arg6: memref<1x16xf32, #tpu.memory_space<vmem>>, %arg7: memref<1x1xf32, #tpu.memory_space<vmem>>, %arg8: memref<8x1xf32, #tpu.memory_space<vmem>>) attributes {dimension_semantics = [#tpu.dimension_semantics<parallel>], iteration_bounds = array<i64: 3>, scalar_prefetch = 0 : i64, scratch_operands = 0 : i64, tpu.core_type = #tpu.core_type<tc>, window_params = [{transform_indices = @transform_0, window_bounds = array<i64: 8, 16>}, {pipeline_mode = #tpu.pipeline_mode<synchronous>, transform_indices = @transform_1, window_bounds = array<i64: 16, 32>}, {pipeline_mode = #tpu.pipeline_mode<synchronous>, transform_indices = @transform_2, window_bounds = array<i64: 1, 32>}, {pipeline_mode = #tpu.pipeline_mode<synchronous>, transform_indices = @transform_3, window_bounds = array<i64: 32, 16>}, {pipeline_mode = #tpu.pipeline_mode<synchronous>, transform_indices = @transform_4, window_bounds = array<i64: 1, 16>}, {pipeline_mode = #tpu.pipeline_mode<synchronous>, transform_indices = @transform_5, window_bounds = array<i64: 1, 16>}, {pipeline_mode = #tpu.pipeline_mode<synchronous>, transform_indices = @transform_6, window_bounds = array<i64: 1, 1>}, {transform_indices = @transform_7, window_bounds = array<i64: 8, 1>}]} {
    %c0 = arith.constant 0 : index
    %c0_0 = arith.constant 0 : index
    %0 = vector.load %arg1[%c0, %c0_0] : memref<8x16xf32, #tpu.memory_space<vmem>>, vector<8x16xf32>
    %c0_1 = arith.constant 0 : index
    %c0_2 = arith.constant 0 : index
    %1 = vector.load %arg2[%c0_1, %c0_2] : memref<16x32xf32, #tpu.memory_space<vmem>>, vector<16x32xf32>
    %cst = arith.constant dense<0.000000e+00> : vector<8x32xf32>
    %2 = tpu.matmul %0, %1, %cst {dimension_numbers = #tpu.dot_dimension_numbers<[1], [0], [0], [1], [0, 0, 1, 1], [], []>} : vector<8x16xf32>, vector<16x32xf32>, vector<8x32xf32> -> vector<8x32xf32>
    %c0_3 = arith.constant 0 : index
    %c0_4 = arith.constant 0 : index
    %3 = vector.load %arg3[%c0_3, %c0_4] : memref<1x32xf32, #tpu.memory_space<vmem>>, vector<1x32xf32>
    %4 = vector.broadcast %3 : vector<1x32xf32> to vector<8x32xf32>
    %5 = arith.addf %2, %4 : vector<8x32xf32>
    %cst_5 = arith.constant 0.00999999977 : f32
    %6 = vector.broadcast %cst_5 : f32 to vector<8x32xf32>
    %7 = arith.mulf %6, %5 : vector<8x32xf32>
    %8 = arith.maximumf %5, %7 : vector<8x32xf32>
    %c0_6 = arith.constant 0 : index
    %c0_7 = arith.constant 0 : index
    %9 = vector.load %arg4[%c0_6, %c0_7] : memref<32x16xf32, #tpu.memory_space<vmem>>, vector<32x16xf32>
    %cst_8 = arith.constant dense<0.000000e+00> : vector<8x16xf32>
    %10 = tpu.matmul %8, %9, %cst_8 {dimension_numbers = #tpu.dot_dimension_numbers<[1], [0], [0], [1], [0, 0, 1, 1], [], []>} : vector<8x32xf32>, vector<32x16xf32>, vector<8x16xf32> -> vector<8x16xf32>
    %c0_9 = arith.constant 0 : index
    %c0_10 = arith.constant 0 : index
    %11 = vector.load %arg5[%c0_9, %c0_10] : memref<1x16xf32, #tpu.memory_space<vmem>>, vector<1x16xf32>
    %12 = vector.broadcast %11 : vector<1x16xf32> to vector<8x16xf32>
    %13 = arith.addf %10, %12 : vector<8x16xf32>
    %cst_11 = arith.constant 0.00999999977 : f32
    %14 = vector.broadcast %cst_11 : f32 to vector<8x16xf32>
    %15 = arith.mulf %14, %13 : vector<8x16xf32>
    %16 = arith.maximumf %13, %15 : vector<8x16xf32>
    %c0_12 = arith.constant 0 : index
    %c0_13 = arith.constant 0 : index
    %17 = vector.load %arg6[%c0_12, %c0_13] : memref<1x16xf32, #tpu.memory_space<vmem>>, vector<1x16xf32>
    %18 = vector.broadcast %17 : vector<1x16xf32> to vector<8x16xf32>
    %19 = arith.mulf %16, %18 : vector<8x16xf32>
    %cst_14 = arith.constant dense<0.000000e+00> : vector<8xf32>
    %20 = vector.multi_reduction <add>, %19, %cst_14 [1] : vector<8x16xf32> to vector<8xf32>
    %21 = vector.shape_cast %20 : vector<8xf32> to vector<8x1xf32>
    %c0_15 = arith.constant 0 : index
    %c0_16 = arith.constant 0 : index
    %22 = vector.load %arg7[%c0_15, %c0_16] : memref<1x1xf32, #tpu.memory_space<vmem>>, vector<1x1xf32>
    %23 = vector.broadcast %22 : vector<1x1xf32> to vector<8x1xf32>
    %24 = arith.addf %21, %23 : vector<8x1xf32>
    %cst_17 = arith.constant 0.000000e+00 : f32
    %25 = vector.broadcast %cst_17 : f32 to vector<8x1xf32>
    %26 = arith.subf %25, %24 : vector<8x1xf32>
    %27 = math.exp %26 : vector<8x1xf32>
    %cst_18 = arith.constant 1.000000e+00 : f32
    %28 = vector.broadcast %cst_18 : f32 to vector<8x1xf32>
    %29 = arith.addf %28, %27 : vector<8x1xf32>
    %30 = tpu.reciprocal %29 : vector<8x1xf32> -> vector<8x1xf32>
    %c0_19 = arith.constant 0 : index
    %c0_20 = arith.constant 0 : index
    %31 = vector.load %arg8[%c0_19, %c0_20] : memref<8x1xf32, #tpu.memory_space<vmem>>, vector<8x1xf32>
    tpu.vector_store %arg8[%c0_19, %c0_20], %30 {strides = array<i32>} : memref<8x1xf32, #tpu.memory_space<vmem>>, vector<8x1xf32>,
    return
  }
  func.func @transform_0(%arg0: i32) -> (i32, i32) {
    %c0_i32 = arith.constant 0 : i32
    %c0_i32_0 = arith.constant 0 : i32
    return %arg0, %c0_i32 : i32, i32
  }
  func.func @transform_1(%arg0: i32) -> (i32, i32) {
    %c0_i32 = arith.constant 0 : i32
    %c0_i32_0 = arith.constant 0 : i32
    %c0_i32_1 = arith.constant 0 : i32
    return %c0_i32, %c0_i32_0 : i32, i32
  }
  func.func @transform_2(%arg0: i32) -> (i32, i32) {
    %c0_i32 = arith.constant 0 : i32
    %c0_i32_0 = arith.constant 0 : i32
    %c0_i32_1 = arith.constant 0 : i32
    return %c0_i32, %c0_i32_0 : i32, i32
  }
  func.func @transform_3(%arg0: i32) -> (i32, i32) {
    %c0_i32 = arith.constant 0 : i32
    %c0_i32_0 = arith.constant 0 : i32
    %c0_i32_1 = arith.constant 0 : i32
    return %c0_i32, %c0_i32_0 : i32, i32
  }
  func.func @transform_4(%arg0: i32) -> (i32, i32) {
    %c0_i32 = arith.constant 0 : i32
    %c0_i32_0 = arith.constant 0 : i32
    %c0_i32_1 = arith.constant 0 : i32
    return %c0_i32, %c0_i32_0 : i32, i32
  }
  func.func @transform_5(%arg0: i32) -> (i32, i32) {
    %c0_i32 = arith.constant 0 : i32
    %c0_i32_0 = arith.constant 0 : i32
    %c0_i32_1 = arith.constant 0 : i32
    return %c0_i32, %c0_i32_0 : i32, i32
  }
  func.func @transform_6(%arg0: i32) -> (i32, i32) {
    %c0_i32 = arith.constant 0 : i32
    %c0_i32_0 = arith.constant 0 : i32
    %c0_i32_1 = arith.constant 0 : i32
    return %c0_i32, %c0_i32_0 : i32, i32
  }
  func.func @transform_7(%arg0: i32) -> (i32, i32) {
    %c0_i32 = arith.constant 0 : i32
    %c0_i32_0 = arith.constant 0 : i32
    return %arg0, %c0_i32 : i32, i32
  }
}

</mosaic_0001>

<bundles_post_ra>
// kernel: tpu_custom_call.1
= control target key start
LH: loop header
LB: loop body
LE: loop exit
PB: predicated region body
PF: predicated region fallthrough
CT: control target
= control target key end

     0   :  { %s647_s26 = smov 0   ;;  %s700_s0 = inlined_call_operand.vmem [shape: f32[24,16], index: 0, kind: input, shape index: {}]   ;;  %s701_s1 = inlined_call_operand.vmem [shape: f32[16,32], index: 1, kind: input, shape index: {}]   ;;  %s702_s2 = inlined_call_operand.vmem [shape: f32[1,32], index: 2, kind: input, shape index: {}]   ;;  %s703_s3 = inlined_call_operand.vmem [shape: f32[32,16], index: 3, kind: input, shape index: {}]   ;;  %s704_s4 = inlined_call_operand.vmem [shape: f32[1,16], index: 4, kind: input, shape index: {}]   ;;  %s705_s5 = inlined_call_operand.vmem [shape: f32[1,16], index: 5, kind: input, shape index: {}]   ;;  %s706_s6 = inlined_call_operand.<no memory space> [shape: f32[1,1], index: 6, kind: input, shape index: {}]   ;;  %s707_s7 = inlined_call_operand.vmem [shape: f32[24,1], index: 7, kind: output, shape index: {}]  }
   0x1   :  { %v12_v0 = vstv %s706_s6 }
   0x2   :  { %13 = vst [vmem:[#allocation2] sm:$0x1] %v12_v0 }
   0x3 LB: > { %s528_s27 = sadd.s32 4294967295, %s599_s26   ;;  %p532_p0 = scmp.ge.s32.totalorder %s599_s26, 1  ;;  %s599_s26 = sphi %s647_s26, %s19_s26  }
   0x4   : > { %p238_p1 = scmp.lt.s32.totalorder %s599_s26, 4 }
   0x6   : > { %p239_p2 = pnand %p532_p0, %p238_p1 }
   0x7   : > { %v277_v1 = vld [vmem:[%s701_s1] sm:$0xff] (!%p239_p2)  ;;  %v278_v2 = vld [vmem:[%s701_s1 + $0x8] sm:$0xff] (!%p239_p2)  ;;  %p268_p3 = scmp.lt.s32.totalorder (!%p239_p2), %s528_s27, 2  ;;  %v601_v3 = vmov (!%p239_p2), 0.0|0.0   ;;  %vm602_vm0 = vmmov (!%p239_p2), 0   ;;  %v603_v5 = vmov (!%p239_p2), 0.0  }
   0x8   : > { %242 = sbr.rel (%p239_p2) target bundleno = 631 (0x277), region = 48  ;;  %569 = vmatprep.subr.bf16.mxu0 (!%p239_p2), %v601_v3  ;;  %v570_v4 = vpack.c.bf16 (!%p239_p2), %v278_v2, %v277_v1  ;;  %555 = vmatprep.mubr.msk.f32.mxu0 (!%p239_p2), %vm602_vm0, %v603_v5  ;;  %vm286_vm1 = vcmask (!%p239_p2), 130048   ;;  %v362_v7 = vld [vmem:[%s703_s3] sm:$0xff] (!%p239_p2)  ;;  %v363_v8 = vld [vmem:[%s703_s3 + $0x8] sm:$0xff] (!%p239_p2)  ;;  %v364_v10 = vld [vmem:[%s703_s3 + $0x10] sm:$0xff] (!%p239_p2)  ;;  %vm373_vm2 = vcmask (!%p239_p2), 261120  }
   0x9   : > { %572 = vmatprep.subr.bf16.mxu1 (!%p239_p2), %v601_v3  ;;  %566 = vmatprep.mubr.msk.f32.mxu1 (!%p239_p2), %vm602_vm0, %v603_v5  ;;  %v573_v9 = vpack.c.bf16 (!%p239_p2), %v363_v8, %v362_v7  ;;  %v365_v11 = vld [vmem:[%s703_s3 + $0x18] sm:$0xff] (!%p239_p2)  ;;  %v535_v13 = vld [vmem:[%s702_s2] ss:$0 sm:$0xff] (!%p239_p2)  ;;  %vm473_vm3 = vcmask (!%p239_p2), 7168  }
   0xa   : > { %571 = vmatpush3.bf16.msra.mxu0 (!%p239_p2), %v570_v4  ;;  %v576_v12 = vpack.c.bf16 (!%p239_p2), %v365_v11, %v364_v10  ;;  %v537_v19 = vld [vmem:[%s704_s4] ss:$0 sm:$0xff] (!%p239_p2) }
   0xb   : > { %574 = vmatpush3.bf16.msra.mxu1 (!%p239_p2), %v573_v9  ;;  %v539_v24 = vld [vmem:[%s705_s5] ss:$0 sm:$0xff] (!%p239_p2) }
   0xc   : > { %575 = vmatprep.subr.bf16.mxu1 (!%p239_p2), %v601_v3  ;;  %v540_v28 = vld [vmem:[#allocation2] ss:$0 sm:$0xff] (!%p239_p2) }
   0xf   : > { %s709_s27 = smov (!%p268_p3, %s528_s27), 2  ;;  %577 = vmatpush3.bf16.msra.mxu1 %v576_v12 }
  0x10   : > { %s533_s8 = sshll.u32 %s709_s27, 3 }
  0x11   : > { %s271_s11 = scalar_lea.vmem %s700_s0, %s533_s8  ;;  %s275_s6 = scalar_lea.vmem %s707_s7, %s533_s8 }
  0x12   : > { %v276_v6 = vld [vmem:[%s271_s11] sm:$0xff] }
  0x13   : > { %556 = vmatmul.mubr.msk.f32.vlgmr.msra.gmra.mrb[0].mxu0 %vm286_vm1, %v276_v6 }
  0xe6   : > { %v356_v14 = vpop.f32.mrb[0].mxu0 }
  0xe7   : > { %v357_v15 = vadd.f32 %v535_v13, %v356_v14  ;;  %v557_v16 = vpop.f32.mrb[1].mxu0 }
  0xe9   : > { %v360_v17 = vmul.f32 0.01, %v357_v15 }
  0xeb   : > { %v361_v18 = vmax.f32 %v357_v15, %v360_v17 }
  0xed   : > { %567 = vmatmul.mubr.msk.f32.vlgmr.msra.gmra.mrb[0].mxu1 %vm373_vm2, %v361_v18 }
 0x1c0   : > { %v443_v20 = vpop.f32.mrb[0].mxu1 }
 0x1c1   : > { %v444_v21 = vadd.f32 %v537_v19, %v443_v20  ;;  %v568_v22 = vpop.f32.mrb[1].mxu1 }
 0x1c3   : > { %v447_v23 = vmul.f32 0.01, %v444_v21 }
 0x1c5   : > { %v448_v25 = vmax.f32 %v444_v21, %v447_v23 }
 0x1c7   : > { %v456_v26 = vmul.f32 %v539_v24, %v448_v25 }
 0x1c9   : > { %v457_v27 = vsel %vm286_vm1, %v456_v26, 0.0 }
 0x1ca   : > { %458 = vadd.xlane.f32.xlu0 %v457_v27 }
 0x257   : > { %v459_v29 = vpop.xlane.xlu0 %458 }
 0x258   : > { %v467_v30 = vadd.f32 %v540_v28, %v459_v29 }
 0x25a   : > { %v468_v31 = vsub.f32 0.0, %v467_v30 }
 0x25c   : > { %v469_v32 = vmul.f32 1.442695, %v468_v31 }
 0x25e   : > { %589 = vpow2.f32 %v469_v32 }
 0x268   : > { %v590_v33 = vpop.eup %589 }
 0x269   : > { %v471_v34 = vadd.f32 1.0, %v590_v33 }
 0x26b   : > { %591 = vrcp.f32 %v471_v34 }
 0x275   : > { %v592_v35 = vpop.eup %591 }
 0x276   : > { %474 = vst.msk [vmem:[%s275_s6] sm:$0xff] %vm473_vm3, %v592_v35 }
 0x277 PF: > { %s19_s26 = sadd.s32 1, %s599_s26  }
 0x278   : > { %p16_p4 = scmp.ge.s32.totalorder %s19_s26, 5  }
 0x27a   :  { %18 = sbr.rel (!%p16_p4) target bundleno = 3 (0x3), region = 78 }

</bundles_post_ra>
